<compile_context>
chip_gen: v7x
topology: tpu7x:2x2x1
jax: 0.10.0
libtpu: 0.0.40
codegen_flags: <defaults>
</compile_context>

<pallas_src>
import functools

import jax
import jax.numpy as jnp
from jax.experimental import pallas as pl
from jax.experimental.pallas import tpu as pltpu


def _cdiv(a: int, b: int) -> int:
    return -(-a // b)


def _qrelu_kernel(x_ref, o_ref, *, hw: int):
    # View is (B*C, 4*H*W): within each row the layout is
    # [real: 0..hw) | i: hw..2hw) | j | k].  Real <=> global column < hw.
    x = x_ref[...]
    tile_c = x.shape[1]
    col0 = pl.program_id(1) * tile_c
    lane = jax.lax.broadcasted_iota(jnp.int32, (1, tile_c), 1)
    is_real = (col0 + lane) < hw                       # (1, tile_c), broadcasts over rows
    relu_x = jnp.maximum(x, jnp.zeros((), x.dtype))
    o_ref[...] = jnp.where(is_real, x, relu_x)


def _target_block_bytes() -> int:
    # ~2 MiB blocks sit at the measured HBM-roofline plateau on v5e/v6e; on
    # v7x (64 MiB VMEM/TC, ~2.3x faster HBM) use ~4 MiB so the ~0.35 us
    # per-grid-step overhead stays negligible.  2x(in)+2x(out) double buffers
    # then total 8-16 MiB: under the default scoped VMEM everywhere
    # (v5e 16 MiB, v6e/v7x 32 MiB), so no vmem_limit_bytes needed.
    target = 2 * 1024 * 1024
    try:
        info = pltpu.get_tpu_info()
        vmem = int(getattr(info, "vmem_capacity_bytes", 128 * 1024 * 1024))
        if vmem <= 96 * 1024 * 1024:  # v7x-class TensorCore (64 MiB VMEM)
            target = 4 * 1024 * 1024
    except Exception:
        pass
    return target


def _choose_tiles(rows: int, cols: int, itemsize: int, target_bytes: int):
    """Pick an (aligned) block shape; grid uses cdiv so tiles need not divide."""
    sub_align = max(8, 32 // itemsize)   # 8 f32, 16 bf16, 32 int8/fp8
    lane_align = 128
    target_elems = max(sub_align * lane_align, target_bytes // itemsize)

    # Lane tile: multiple of 128 (lane-dense vst), or the full dim if narrower.
    if cols <= lane_align:
        tile_c = cols
    else:
        row_floor = max(1, min(rows, sub_align))
        cap_c = max(lane_align, target_elems // row_floor)
        tile_c = min(cols, cap_c)
        tile_c = max(lane_align, (tile_c // lane_align) * lane_align)

    # Row tile: multiple of the dtype's sublane packing, or full dim if smaller.
    if rows <= sub_align:
        tile_r = rows
    else:
        cap_r = max(sub_align, target_elems // max(tile_c, 1))
        tile_r = min(rows, cap_r)
        tile_r = max(sub_align, (tile_r // sub_align) * sub_align)

    # Megacore (v7x, 2 TCs): make sure there are >= 2 grid steps on a parallel
    # axis; prefer splitting rows, else lanes.  Harmless (~0.35us) on 1-TC chips.
    if _cdiv(rows, tile_r) * _cdiv(cols, tile_c) < 2:
        if rows >= 2 * sub_align:
            tile_r = sub_align * max(1, _cdiv(_cdiv(rows, 2), sub_align))
        elif cols >= 2 * lane_align:
            tile_c = lane_align * max(1, _cdiv(_cdiv(cols, 2), lane_align))

    return tile_r, tile_c


def qrelu(x: jax.Array) -> jax.Array:
    """Quaternion ReLU. x: (B, C, 4, H, W) -> same shape/dtype."""
    B, C, Q, H, W = x.shape
    assert Q == 4, "quaternion axis must have size 4"
    rows = B * C
    hw = H * W
    cols = Q * hw

    x2 = x.reshape(rows, cols)  # contiguous row-major view; q-major within each row
    itemsize = jnp.dtype(x.dtype).itemsize
    tile_r, tile_c = _choose_tiles(rows, cols, itemsize, _target_block_bytes())
    grid = (_cdiv(rows, tile_r), _cdiv(cols, tile_c))

    out2 = pl.pallas_call(
        functools.partial(_qrelu_kernel, hw=hw),
        out_shape=jax.ShapeDtypeStruct((rows, cols), x.dtype),
        grid_spec=pltpu.PrefetchScalarGridSpec(
            num_scalar_prefetch=0,
            grid=grid,
            in_specs=[pl.BlockSpec((tile_r, tile_c), lambda i, j: (i, j))],
            out_specs=pl.BlockSpec((tile_r, tile_c), lambda i, j: (i, j)),
        ),
        compiler_params=pltpu.CompilerParams(
            dimension_semantics=("parallel", "parallel"),
        ),
    )(x2)

    return out2.reshape(B, C, Q, H, W)


def _qrelu_ref(x: jax.Array) -> jax.Array:
    """Pure-JAX reference matching the PyTorch forward exactly."""
    real = x[:, :, 0:1, :, :]
    imag = jnp.maximum(x[:, :, 1:, :, :], 0)
    return jnp.concatenate([real, imag], axis=2)


if __name__ == "__main__":
    key = jax.random.PRNGKey(0)

    # Primary small test (matches the module's expected layout).
    B, C, Q, H, W = 2, 4, 4, 16, 16
    x = jax.random.normal(key, (B, C, Q, H, W), dtype=jnp.float32)
    out = qrelu(x)
    jax.block_until_ready(out)
    ref = _qrelu_ref(x)
    assert out.shape == x.shape and out.dtype == x.dtype
    assert jnp.array_equal(out, ref), "mismatch vs reference (f32)"

    # Unaligned shape: rows not a multiple of 8, cols not a multiple of 128
    # (exercises the cdiv-grid tail masking — no single-block fallback).
    xu = jax.random.normal(jax.random.PRNGKey(1), (1, 3, 4, 7, 9), dtype=jnp.float32)
    outu = qrelu(xu)
    jax.block_until_ready(outu)
    assert jnp.array_equal(outu, _qrelu_ref(xu)), "mismatch vs reference (unaligned)"

    # bf16 path (dtype-aware sublane alignment).
    xb = jax.random.normal(jax.random.PRNGKey(2), (2, 4, 4, 16, 16), dtype=jnp.bfloat16)
    outb = qrelu(xb)
    jax.block_until_ready(outb)
    assert jnp.array_equal(outb, _qrelu_ref(xb)), "mismatch vs reference (bf16)"

    print("KERNEL_OK")
</pallas_src>

<mosaic_0001>
module attributes {stable_mosaic.version = 11 : i64} {
  func.func @_qrelu_kernel(%arg0: i32, %arg1: i32, %arg2: memref<8x512xf32, #tpu.memory_space<vmem>>, %arg3: memref<8x512xf32, #tpu.memory_space<vmem>>) attributes {dimension_semantics = [#tpu.dimension_semantics<parallel>, #tpu.dimension_semantics<parallel>], iteration_bounds = array<i64: 1, 2>, scalar_prefetch = 0 : i64, scratch_operands = 0 : i64, tpu.core_type = #tpu.core_type<tc>, window_params = [{transform_indices = @transform_0, window_bounds = array<i64: 8, 512>}, {transform_indices = @transform_1, window_bounds = array<i64: 8, 512>}]} {
    %c0 = arith.constant 0 : index
    %c0_0 = arith.constant 0 : index
    %0 = vector.load %arg2[%c0, %c0_0] : memref<8x512xf32, #tpu.memory_space<vmem>>, vector<8x512xf32>
    %c512_i32 = arith.constant 512 : i32
    %1 = arith.muli %arg1, %c512_i32 : i32
    %2 = tpu.iota {dimensions = array<i32: 1>} : vector<1x512xi32>
    %3 = vector.broadcast %1 : i32 to vector<1x512xi32>
    %4 = arith.addi %3, %2 : vector<1x512xi32>
    %c256_i32 = arith.constant 256 : i32
    %5 = vector.broadcast %c256_i32 : i32 to vector<1x512xi32>
    %6 = arith.cmpi slt, %4, %5 : vector<1x512xi32>
    %cst = arith.constant 0.000000e+00 : f32
    %7 = vector.broadcast %cst : f32 to vector<8x512xf32>
    %8 = arith.maximumf %0, %7 : vector<8x512xf32>
    %9 = vector.shape_cast %6 : vector<1x512xi1> to vector<1x512xi1>
    %10 = vector.broadcast %9 : vector<1x512xi1> to vector<8x512xi1>
    %11 = arith.select %10, %0, %8 : vector<8x512xi1>, vector<8x512xf32>
    %c0_1 = arith.constant 0 : index
    %c0_2 = arith.constant 0 : index
    %12 = vector.load %arg3[%c0_1, %c0_2] : memref<8x512xf32, #tpu.memory_space<vmem>>, vector<8x512xf32>
    tpu.vector_store %arg3[%c0_1, %c0_2], %11 {strides = array<i32>} : memref<8x512xf32, #tpu.memory_space<vmem>>, vector<8x512xf32>,
    return
  }
  func.func @transform_0(%arg0: i32, %arg1: i32) -> (i32, i32) {
    %c0_i32 = arith.constant 0 : i32
    return %arg0, %arg1 : i32, i32
  }
  func.func @transform_1(%arg0: i32, %arg1: i32) -> (i32, i32) {
    %c0_i32 = arith.constant 0 : i32
    return %arg0, %arg1 : i32, i32
  }
}

</mosaic_0001>

<bundles_post_ra>
// kernel: tpu_custom_call.1
= control target key start
LH: loop header
LB: loop body
LE: loop exit
PB: predicated region body
PF: predicated region fallthrough
CT: control target
= control target key end

     0   :  { %6 = vsyncpa [#allocation3], 0  ;;  %s671_s0 = inlined_call_operand.hbm [shape: f32[8,1024], index: 0, kind: input, shape index: {}]   ;;  %s672_s1 = inlined_call_operand.hbm [shape: f32[8,1024], index: 1, kind: output, shape index: {}]  }
   0x1   :  { %8 = vsyncpa [#allocation3 + $0x1], 0 }
   0x2   :  { %9 = vsyncpa [#allocation4], 0 }
   0x3   :  { %11 = vsyncpa [#allocation4 + $0x1], 0  ;;  %s499_s6 = smov 0   ;;  %s501_s7 = smov 0  }
   0x4   :  { %s503_s8 = smov 0   ;;  %s505_s9 = smov 0  }
   0x5   :  { %s507_s10 = smov 0   ;;  %s509_s11 = smov 0  }
   0x6 LB: > { %s293_s12 = sadd.s32 4294967295, %s485_s11   ;;  %s294_s13 = sadd.s32 4294967294, %s485_s11   ;;  %s485_s11 = sphi %s509_s11, %s17_s11   ;;  %s481_s10 = sphi %s507_s10, %s688_s10   ;;  %s477_s9 = sphi %s505_s9, %s687_s9   ;;  %s473_s8 = sphi %s503_s8, %s686_s8   ;;  %s469_s7 = sphi %s501_s7, %s685_s7   ;;  %s465_s6 = sphi %s499_s6, %s684_s6  }
   0x7   : > { %s26_s14 = sadd.s32 1, %s481_s10  ;;  %s38_s15 = sadd.s32 1, %s473_s8 }
   0x8   : > { %p27_p0 = scmp.ge.s32.totalorder %s26_s14, 2  ;;  %p45_p1 = scmp.ne.s32.totalorder %s473_s8, %s469_s7 }
   0x9   : > { %p46_p2 = scmp.eq.s32.totalorder %s485_s11, 0  ;;  %p51_p3 = scmp.ne.s32.totalorder %s469_s7, %s465_s6 }
   0xa   : > { %s690_s14 = smov (%p27_p0, %s26_s14), 0  ;;  %p52_p5 = scmp.eq.s32.totalorder %s293_s12, 0 }
   0xb   : > { %p540_p4 = por %p46_p2, %p45_p1  ;;  %s34_s17 = ssub.s32 %s481_s10, %s690_s14 }
   0xc   : > { %p77_p6 = scmp.eq.s32.totalorder %s293_s12, 1  ;;  %p36_p7 = scmp.eq.s32.totalorder %s34_s17, 0 }
   0xd   : > { %p546_p8 = por %p52_p5, %p51_p3  ;;  %p83_p10 = scmp.eq.s32.totalorder %s294_s13, 1 }
   0xe   : > { %p550_p9 = por %p77_p6, %p45_p1  ;;  %p323_p13 = scmp.lt.s32.totalorder %s485_s11, 2 }
   0xf   : > { %s555_s20 = scalar_select %p36_p7, %s473_s8, %s38_s15  }
  0x10   : > { %s676_s19 = scalar_select %p550_p9, 1, 0 }
  0x11   : > { %p557_p11 = por %p83_p10, %p51_p3  ;;  %s103_s22 = sand.u32 1, %s473_s8  }
  0x12   : > { %s297_s23 = sshll.u32 %s103_s22, 5  ;;  %s309_s24 = sshll.u32 %s481_s10, 9 }
  0x13   : > { %s677_s21 = scalar_select %p557_p11, 1, 0 }
  0x14   : > { %s568_s27 = scalar_lea.hbm %s671_s0, %s309_s24  ;;  %s107_s28 = scalar_lea.vmem [#allocation2], %s297_s23 }
  0x15   : > { %s117_s29 = sshll.u32 %s107_s28, 4  ;;  %p574_p0 = pnand %p323_p13, %p540_p4  ;;  %s570_s29 = int_to_ptr.vmem [resolvable:$true] %s117_s29 }
  0x16   : > { %s104_s2 = scalar_lea.sflag [#allocation3], %s103_s22  ;;  %s373_s3 = scalar_lea.hbm %s568_s27, 512 }
  0x17   : > { %p374_p3 = scmp.ne.s32.totalorder %s568_s27, %s373_s3  ;;  %p375_p5 = pneg %p574_p0 }
  0x18   : > { %s378_s12 = scalar_lea.hbm %s671_s0, 1024  ;;  %p379_p4 = scmp.lt.u32.totalorder %s568_s27, %s671_s0 }
  0x19   : > { %p376_p6 = pnand %p375_p5, %p374_p3  ;;  %p380_p10 = scmp.lt.u32.totalorder %s378_s12, %s373_s3 }
  0x1a   : > { %p382_p12 = scmp.lt.u32.totalorder %s373_s3, %s568_s27 }
  0x1b   : > { %p377_p7 = pneg %p376_p6  ;;  %p381_p13 = por %p380_p10, %p379_p4 }
  0x1d   : > { %p383_p1 = por %p382_p12, %p381_p13 }
  0x1f   : > { %p384_p2 = pnand %p383_p1, %p377_p7 }
  0x21   : > { %387 = shalt.err (!%p384_p2)
}
  0x22   : > { %s388_s16 = scalar_lea.vmem %s570_s29, 512  ;;  %s487_s17 = smov [#allocation2]  }
  0x23   : > { %p389_p3 = scmp.ne.s32.totalorder %s570_s29, %s388_s16  ;;  %s393_s22 = sshll.u32 %s487_s17, 4  ;;  %s394_s22 = int_to_ptr.vmem [resolvable:$false] %s393_s22 }
  0x24   : > { %s395_s23 = scalar_lea.vmem %s394_s22, 1024  ;;  %p396_p9 = scmp.lt.s32.totalorder %s570_s29, %s394_s22 }
  0x25   : > { %p391_p6 = pnand %p389_p3, %p375_p5  ;;  %p397_p4 = scmp.lt.s32.totalorder %s395_s23, %s388_s16 }
  0x27   : > { %p392_p11 = pneg %p391_p6  ;;  %p398_p10 = por %p397_p4, %p396_p9 }
  0x29   : > { %p399_p12 = pnand %p398_p10, %p392_p11 }
  0x2b   : > { %402 = shalt.err (!%p399_p12)
}
  0x2c   : > { %318 = dma.hbm_to_vmem [thread:$0]  (!%p574_p0), %s568_s27, 512, %s570_s29, %s104_s2  }
  0x2d   : > { %p679_p1 = scmp.lt.s32.totalorder %s485_s11, 3  ;;  %p680_p2 = scmp.ge.s32.totalorder %s485_s11, 1 }
  0x2f   : > { %p123_p5 = pnand %p680_p2, %p679_p1 }
  0x30   : > { %s610_s24 = sand.u32 (!%p123_p5), 1, %s469_s7  }
  0x31   : > { %126 = sbr.rel (%p123_p5) target bundleno = 83 (0x53), region = 24  ;;  %s301_s25 = sshll.u32 (!%p123_p5), %s610_s24, 5 }
  0x32   : > { %s129_s26 = scalar_lea.sflag (!%p123_p5), [#allocation3], %s610_s24  ;;  %s132_s28 = scalar_lea.vmem (!%p123_p5), [#allocation2], %s301_s25 }
  0x38   : > { %456 = dma.done.wait (%p546_p8), %s129_s26, 512  }
  0x39   : > { %458 = vsyncadd (%p546_p8), %s129_s26, 4294966784  ;;  %s303_s27 = sshll.u32 %s477_s9, 9  ;;  %v158_v0 = vlaneseq  ;;  %v153_v10 = vld [vmem:[%s132_s28] sm:$0xff]  ;;  %s150_s29 = scalar_lea.vmem [#allocation5], %s301_s25  ;;  %v154_v11 = vld [vmem:[%s132_s28 + $0x8] sm:$0xff] }
  0x3a   : > { %v163_v1 = vstv %s303_s27  ;;  %s209_s30 = sshll.u32 %s150_s29, 4  ;;  %v155_v12 = vld [vmem:[%s132_s28 + $0x10] sm:$0xff]  ;;  %v172_v13 = vmax.f32 %v153_v10, 0.0  ;;  %v173_v14 = vmax.f32 %v154_v11, 0.0  ;;  %v156_v15 = vld [vmem:[%s132_s28 + $0x18] sm:$0xff]  ;;  %s622_s2 = scalar_lea.hbm %s672_s1, %s303_s27  ;;  %s624_s30 = int_to_ptr.vmem [resolvable:$true] %s209_s30 }
  0x3b   : > { %v159_v2 = vand.u32 127, %v158_v0  ;;  %v174_v16 = vmax.f32 %v155_v12, 0.0  ;;  %v175_v17 = vmax.f32 %v156_v15, 0.0  ;;  %s193_s3 = scalar_lea.sflag [#allocation4], %s610_s24  ;;  %s403_s4 = scalar_lea.vmem %s624_s30, 512 }
  0x3c   : > { %p404_p8 = scmp.ne.s32.totalorder %s624_s30, %s403_s4  ;;  %p681_p9 = scmp.ne.s32.totalorder %s676_s19, 0 }
  0x3d   : > { %v164_v3 = vadd.s32 %v163_v1, %v159_v2  ;;  %v160_v4 = vadd.s32 128, %v159_v2  ;;  %v161_v5 = vadd.s32 256, %v159_v2  ;;  %v162_v6 = vadd.s32 384, %v159_v2  ;;  %s488_s5 = smov [#allocation5]  }
  0x3e   : > { %p405_p11 = pnand %p404_p8, %p681_p9  ;;  %s407_s12 = sshll.u32 %s488_s5, 4  ;;  %s408_s12 = int_to_ptr.vmem [resolvable:$false] %s407_s12 }
  0x3f   : > { %v165_v7 = vadd.s32 %v163_v1, %v160_v4  ;;  %v166_v8 = vadd.s32 %v163_v1, %v161_v5  ;;  %v167_v9 = vadd.s32 %v163_v1, %v162_v6  ;;  %vm168_vm0 = vcmp.lt.s32.totalorder %v164_v3, 256  ;;  %s409_s13 = scalar_lea.vmem %s408_s12, 1024  ;;  %p410_p7 = scmp.lt.s32.totalorder %s624_s30, %s408_s12 }
  0x40   : > { %v184_v18 = vsel %vm168_vm0, %v153_v10, %v172_v13  ;;  %p406_p0 = pneg %p405_p11  ;;  %p411_p13 = scmp.lt.s32.totalorder %s409_s13, %s403_s4 }
  0x41   : > { %vm169_vm1 = vcmp.lt.s32.totalorder %v165_v7, 256  ;;  %vm170_vm2 = vcmp.lt.s32.totalorder %v166_v8, 256  ;;  %vm171_vm3 = vcmp.lt.s32.totalorder %v167_v9, 256  ;;  %188 = vst [vmem:[%s150_s29] sm:$0xff] %v184_v18 }
  0x42   : > { %v185_v19 = vsel %vm169_vm1, %v154_v11, %v173_v14  ;;  %v186_v20 = vsel %vm170_vm2, %v155_v12, %v174_v16  ;;  %v187_v21 = vsel %vm171_vm3, %v156_v15, %v175_v17  ;;  %p412_p3 = por %p411_p13, %p410_p7 }
  0x43   : > { %189 = vst [vmem:[%s150_s29 + $0x8] sm:$0xff] %v185_v19  ;;  %190 = vst [vmem:[%s150_s29 + $0x10] sm:$0xff] %v186_v20 }
  0x44   : > { %191 = vst [vmem:[%s150_s29 + $0x18] sm:$0xff] %v187_v21  ;;  %p413_p6 = pnand %p412_p3, %p406_p0 }
  0x46   : > { %416 = shalt.err (!%p413_p6)
}
  0x47   : > { %s417_s15 = scalar_lea.hbm %s622_s2, 512  ;;  %s421_s22 = scalar_lea.hbm %s672_s1, 1024 }
  0x48   : > { %p418_p4 = scmp.ne.s32.totalorder %s622_s2, %s417_s15  ;;  %p422_p1 = scmp.lt.u32.totalorder %s622_s2, %s672_s1 }
  0x49   : > { %p423_p2 = scmp.lt.u32.totalorder %s421_s22, %s417_s15  ;;  %p425_p8 = scmp.lt.u32.totalorder %s417_s15, %s622_s2 }
  0x4a   : > { %p419_p10 = pnand %p418_p4, %p681_p9 }
  0x4b   : > { %p424_p5 = por %p423_p2, %p422_p1 }
  0x4c   : > { %p420_p12 = pneg %p419_p10 }
  0x4d   : > { %p426_p11 = por %p425_p8, %p424_p5 }
  0x4f   : > { %p427_p0 = pnand %p426_p11, %p420_p12 }
  0x51   : > { %430 = shalt.err (!%p427_p0)
}
  0x52   : > { %313 = dma.vmem_to_hbm [thread:$0]  (%p681_p9), %s624_s30, 512, %s622_s2, %s193_s3  }
  0x53 PF: > { %s221_s25 = sand.u32 1, %s465_s6   ;;  %p682_p7 = scmp.ne.s32.totalorder %s677_s21, 0 }
  0x54   : > { %p683_p13 = scmp.ge.s32.totalorder %s485_s11, 2  ;;  %s222_s26 = scalar_lea.sflag [#allocation4], %s221_s25 }
  0x56   : > { %p320_p3 = pnand %p683_p13, %p682_p7 }
  0x58   : > { %460 = dma.done.wait (!%p320_p3), %s222_s26, 512  }
  0x59   : > { %462 = vsyncadd (!%p320_p3), %s222_s26, 4294966784  ;;  %s17_s11 = sadd.s32 1, %s485_s11   ;;  %s684_s6 = smov %s469_s7 }
  0x5a   : > { %p14_p6 = scmp.ge.s32.totalorder %s17_s11, 4   ;;  %s685_s7 = smov %s473_s8 }
  0x5b   : > { %s686_s8 = smov %s555_s20  ;;  %s687_s9 = smov %s481_s10 }
  0x5c   : > { %s688_s10 = smov %s690_s14  ;;  %16 = sbr.rel (!%p14_p6) target bundleno = 6 (0x6), region = 69 }
  0x63   :  { %227 = vsyncpa [#allocation3], 1 }
  0x64   :  { %229 = vsyncpa [#allocation3 + $0x1], 1 }
  0x65   :  { %230 = vsyncpa [#allocation4], 1 }
  0x66   :  { %232 = vsyncpa [#allocation4 + $0x1], 1 }

</bundles_post_ra>
